<compile_context>
chip_gen: v6e
topology: v6e:2x2x1
jax: 0.10.0
libtpu: 0.0.40
codegen_flags: <defaults>
</compile_context>

<pallas_src>
import functools

import jax
import jax.numpy as jnp
from jax.experimental import pallas as pl
from jax.experimental.pallas import tpu as pltpu

_LANES = 128

# Degree-6 Taylor expansion of f(s) = log1p(exp(-s)) about s = 0.5, valid on [0, 1]
# (max abs error ~1.5e-6).  Evaluated with Horner on the VPU -> zero EUP pushes.
_SP_COEFFS = (0.47407698, -0.37754067, 0.11750186, -0.00959280,
              -0.00401486, 0.00087297, 0.00018836)


def _softplus_neg_unit(s):
    """log1p(exp(-s)) for s in [0, 1] via a VPU-only polynomial."""
    d = s - 0.5
    acc = jnp.float32(_SP_COEFFS[-1])
    for coef in _SP_COEFFS[-2::-1]:
        acc = acc * d + coef
    return acc


def _seg_loss_partials_kernel(x_ref, t_ref, out_ref, *, rows_per_chunk,
                              chunks_per_split, true_n, may_need_mask):
    # Grid: (n_split parallel, B parallel, chunks arbitrary).  The output block
    # depends only on (split, b) so it stays resident across the chunk axis and
    # acts as the accumulator: rows 0:8 sum(s*t), 8:16 sum(s), 16:24 sum(t),
    # 24:32 sum(log1p(exp(-s))).
    c = pl.program_id(0)
    k = pl.program_id(2)

    @pl.when(k == 0)
    def _init():
        out_ref[...] = jnp.zeros_like(out_ref)

    x_raw = x_ref[...]
    t_raw = t_ref[...]

    def to_slab(v):
        # (rows_per_chunk, 128) -> (8, 128): pure full-vreg VPU adds, no XLU.
        return jnp.sum(v.reshape(rows_per_chunk // 8, 8, _LANES), axis=0)

    def accumulate(x, t, maskf):
        s = 0.5 * jnp.tanh(0.5 * x) + 0.5           # sigmoid(x): single EUP push
        sp = _softplus_neg_unit(s)                  # log1p(exp(-s)): VPU only
        if maskf is not None:
            s = s * maskf
            sp = sp * maskf                         # t is already zeroed where invalid
        out_ref[0:8, :] += to_slab(s * t)           # intersection partials
        out_ref[8:16, :] += to_slab(s)              # sum(sigmoid) partials
        out_ref[16:24, :] += to_slab(t)             # sum(target) partials
        out_ref[24:32, :] += to_slab(sp)            # softplus partials

    if may_need_mask:
        ci = c * chunks_per_split + k               # logical chunk index
        block_start = ci * (rows_per_chunk * _LANES)
        has_tail = block_start + rows_per_chunk * _LANES > true_n

        @pl.when(jnp.logical_not(has_tail))
        def _fast():
            accumulate(x_raw.astype(jnp.float32), t_raw.astype(jnp.float32), None)

        @pl.when(has_tail)
        def _masked():
            # Mask BEFORE the transcendentals: ragged-block tails hold undefined
            # data (not zeros), and padded zeros are not neutral for this loss.
            row = jax.lax.broadcasted_iota(jnp.int32, (rows_per_chunk, _LANES), 0)
            lane = jax.lax.broadcasted_iota(jnp.int32, (rows_per_chunk, _LANES), 1)
            idx = block_start + row * _LANES + lane
            valid = idx < true_n
            xm = jnp.where(valid, x_raw.astype(jnp.float32), 0.0)
            tm = jnp.where(valid, t_raw.astype(jnp.float32), 0.0)
            accumulate(xm, tm, valid.astype(jnp.float32))
    else:
        accumulate(x_raw.astype(jnp.float32), t_raw.astype(jnp.float32), None)


def _default_rows_per_chunk():
    # 8192 rows = 4 MiB f32 blocks: 2 inputs x 2 buffers = 16 MiB, fits the 32 MiB
    # default scoped VMEM on v6e/v7x.  v5e (16 MiB default) and unknown chips: 4096.
    try:
        kind = jax.devices()[0].device_kind.lower()
    except Exception:
        return 4096
    if "v6" in kind or "v7" in kind:
        return 8192
    return 4096


def segmentation_loss(segmentations, segmentations_targets,
                      loss_lambda=1.0, smooth=1e-6, target_rows_per_chunk=None):
    """segmentations, segmentations_targets: (B, C, H, W) arrays (f32 or bf16)."""
    B = segmentations.shape[0]
    x = segmentations.reshape(B, -1)            # free reshape, no dtype upcast
    t = segmentations_targets.reshape(B, -1)
    N = x.shape[1]

    if target_rows_per_chunk is None:
        target_rows_per_chunk = _default_rows_per_chunk()

    # Lane-dense layout (rows, 128).  At least 8 rows so every block is (8k, 128).
    n_rows = max(-(-N // _LANES), 8)
    lane_pad = n_rows * _LANES - N
    if lane_pad:
        # TODO(synk): lane-unaligned N (N % 128 != 0) still takes a small jnp.pad
        # copy; tile-aligned N (the common segmentation case) is fully copy-free.
        x = jnp.pad(x, ((0, 0), (0, lane_pad)))
        t = jnp.pad(t, ((0, 0), (0, lane_pad)))
    x3 = x.reshape(B, n_rows, _LANES)
    t3 = t.reshape(B, n_rows, _LANES)

    rows_per_chunk = max(8, min(int(target_rows_per_chunk), (n_rows // 8) * 8))
    rows_per_chunk = (rows_per_chunk // 8) * 8
    n_chunks = -(-n_rows // rows_per_chunk)

    # Dual-TensorCore split of the chunk axis when the batch axis can't feed both
    # cores (v7x megacore).  Duplicate blocks are clamped + masked to zero.
    n_split = 2 if (B == 1 and n_chunks >= 2) else 1
    chunks_per_split = -(-n_chunks // n_split)

    covered = n_split * chunks_per_split * rows_per_chunk * _LANES
    may_need_mask = covered != N

    if n_split == 1:
        in_map = lambda c, b, k: (b, k, 0)
    else:
        in_map = lambda c, b, k: (b, jnp.minimum(c * chunks_per_split + k,
                                                 n_chunks - 1), 0)

    kernel = functools.partial(
        _seg_loss_partials_kernel,
        rows_per_chunk=int(rows_per_chunk),
        chunks_per_split=int(chunks_per_split),
        true_n=int(N),
        may_need_mask=bool(may_need_mask),
    )

    bytes_in = x3.size * x3.dtype.itemsize + t3.size * t3.dtype.itemsize
    bytes_out = n_split * B * 32 * _LANES * 4
    cost = pl.CostEstimate(
        flops=24 * B * N,                 # VPU-dominated: polynomial + partial sums
        transcendentals=B * N,            # single tanh per element
        bytes_accessed=bytes_in + bytes_out,
    )

    partials = pl.pallas_call(
        kernel,
        out_shape=jax.ShapeDtypeStruct((n_split, B, 32, _LANES), jnp.float32),
        grid_spec=pltpu.PrefetchScalarGridSpec(
            num_scalar_prefetch=0,
            grid=(n_split, B, chunks_per_split),
            in_specs=[
                pl.BlockSpec((None, rows_per_chunk, _LANES), in_map),
                pl.BlockSpec((None, rows_per_chunk, _LANES), in_map),
            ],
            out_specs=pl.BlockSpec((None, None, 32, _LANES),
                                   lambda c, b, k: (c, b, 0, 0)),
        ),
        compiler_params=pltpu.CompilerParams(
            dimension_semantics=("parallel", "parallel", "arbitrary"),
        ),
        cost_estimate=cost,
    )(x3, t3)

    # Tiny pure-JAX finalize: combine core slabs, 8x128 -> scalar reductions, and
    # reconstruct bce_sum = s_sum - inter + softplus_sum (exact identity for s in (0,1)).
    partials = jnp.sum(partials, axis=0)                       # (B, 32, 128)
    inter = jnp.sum(partials[:, 0:8, :], axis=(1, 2))
    s_sum = jnp.sum(partials[:, 8:16, :], axis=(1, 2))
    t_sum = jnp.sum(partials[:, 16:24, :], axis=(1, 2))
    sp_sum = jnp.sum(partials[:, 24:32, :], axis=(1, 2))

    bce_mean = jnp.sum(s_sum - inter + sp_sum) / float(B * N)
    dice = (2.0 * inter + smooth) / (s_sum + t_sum + smooth)
    dice_loss = 1.0 - jnp.mean(dice)
    return loss_lambda * (bce_mean + dice_loss)


def _reference_loss(seg, tgt, loss_lambda=1.0, smooth=1e-6):
    """Pure-JAX reference mirroring the PyTorch module exactly."""
    s = jax.nn.sigmoid(seg.astype(jnp.float32))
    t = tgt.astype(jnp.float32)
    bce = jnp.maximum(s, 0.0) - s * t + jnp.log1p(jnp.exp(-jnp.abs(s)))
    bce_loss = jnp.mean(bce)
    inter = jnp.sum(s * t, axis=(1, 2, 3))
    dice = (2.0 * inter + smooth) / (jnp.sum(s, axis=(1, 2, 3))
                                     + jnp.sum(t, axis=(1, 2, 3)) + smooth)
    dice_loss = 1.0 - jnp.mean(dice)
    return loss_lambda * (bce_loss + dice_loss)


if __name__ == "__main__":
    key = jax.random.PRNGKey(0)
    k1, k2, k3, k4, k5, k6 = jax.random.split(key, 6)

    # Case 1: lane-aligned shape (N = 4*16*16 = 1024): copy-free, unmasked fast path.
    segs = jax.random.normal(k1, (2, 4, 16, 16), dtype=jnp.float32)
    tgts = (jax.random.uniform(k2, (2, 4, 16, 16), dtype=jnp.float32) > 0.5
            ).astype(jnp.float32)
    loss = jax.block_until_ready(segmentation_loss(segs, tgts))
    ref = _reference_loss(segs, tgts)
    assert jnp.allclose(loss, ref, rtol=1e-5, atol=1e-5), (loss, ref)

    # Case 2: lane-unaligned shape (N = 4*10*10 = 400): small pad + masked tail path.
    segs2 = jax.random.normal(k3, (2, 4, 10, 10), dtype=jnp.float32)
    tgts2 = (jax.random.uniform(k4, (2, 4, 10, 10), dtype=jnp.float32) > 0.5
             ).astype(jnp.float32)
    loss2 = jax.block_until_ready(segmentation_loss(segs2, tgts2))
    ref2 = _reference_loss(segs2, tgts2)
    assert jnp.allclose(loss2, ref2, rtol=1e-5, atol=1e-5), (loss2, ref2)

    # Case 3: B=1 with an odd chunk count (N = 4*40*32 = 5120, forced small chunks):
    # exercises the dual-core split, the clamped duplicate block, and the mask gate.
    segs3 = jax.random.normal(k5, (1, 4, 40, 32), dtype=jnp.float32)
    tgts3 = (jax.random.uniform(k6, (1, 4, 40, 32), dtype=jnp.float32) > 0.5
             ).astype(jnp.float32)
    loss3 = jax.block_until_ready(
        segmentation_loss(segs3, tgts3, target_rows_per_chunk=8))
    ref3 = _reference_loss(segs3, tgts3)
    assert jnp.allclose(loss3, ref3, rtol=1e-5, atol=1e-5), (loss3, ref3)

    print("KERNEL_OK")
</pallas_src>

<mosaic_0001>
module attributes {stable_mosaic.version = 11 : i64} {
  func.func @_seg_loss_partials_kernel(%arg0: i32, %arg1: i32, %arg2: i32, %arg3: memref<1x8x128xf32, #tpu.memory_space<vmem>>, %arg4: memref<1x8x128xf32, #tpu.memory_space<vmem>>, %arg5: memref<1x1x32x128xf32, #tpu.memory_space<vmem>>) attributes {dimension_semantics = [#tpu.dimension_semantics<parallel>, #tpu.dimension_semantics<parallel>, #tpu.dimension_semantics<arbitrary>], iteration_bounds = array<i64: 1, 2, 1>, scalar_prefetch = 0 : i64, scratch_operands = 0 : i64, tpu.core_type = #tpu.core_type<tc>, window_params = [{transform_indices = @transform_0, window_bounds = array<i64: 1, 8, 128>}, {transform_indices = @transform_1, window_bounds = array<i64: 1, 8, 128>}, {transform_indices = @transform_2, window_bounds = array<i64: 1, 1, 32, 128>}]} {
    %c0_i32 = arith.constant 0 : i32
    %0 = arith.cmpi eq, %arg2, %c0_i32 : i32
    %1 = arith.extui %0 : i1 to i32
    %c0_i32_0 = arith.constant 0 : i32
    %2 = arith.cmpi ne, %1, %c0_i32_0 : i32
    scf.if %2 {
      %cst_49 = arith.constant 0.000000e+00 : f32
      %68 = vector.broadcast %cst_49 : f32 to vector<32x128xf32>
      %c0_50 = arith.constant 0 : index
      %c0_51 = arith.constant 0 : index
      %c0_52 = arith.constant 0 : index
      %c0_53 = arith.constant 0 : index
      %69 = vector.load %arg5[%c0_50, %c0_51, %c0_52, %c0_53] : memref<1x1x32x128xf32, #tpu.memory_space<vmem>>, vector<1x1x32x128xf32>
      %70 = vector.shape_cast %69 : vector<1x1x32x128xf32> to vector<32x128xf32>
      %71 = vector.shape_cast %68 : vector<32x128xf32> to vector<1x1x32x128xf32>
      tpu.vector_store %arg5[%c0_50, %c0_51, %c0_52, %c0_53], %71 {strides = array<i32>} : memref<1x1x32x128xf32, #tpu.memory_space<vmem>>, vector<1x1x32x128xf32>,
    } else {
    }
    %c0 = arith.constant 0 : index
    %c0_1 = arith.constant 0 : index
    %c0_2 = arith.constant 0 : index
    %3 = vector.load %arg3[%c0, %c0_1, %c0_2] : memref<1x8x128xf32, #tpu.memory_space<vmem>>, vector<1x8x128xf32>
    %4 = vector.shape_cast %3 : vector<1x8x128xf32> to vector<8x128xf32>
    %c0_3 = arith.constant 0 : index
    %c0_4 = arith.constant 0 : index
    %c0_5 = arith.constant 0 : index
    %5 = vector.load %arg4[%c0_3, %c0_4, %c0_5] : memref<1x8x128xf32, #tpu.memory_space<vmem>>, vector<1x8x128xf32>
    %6 = vector.shape_cast %5 : vector<1x8x128xf32> to vector<8x128xf32>
    %cst = arith.constant 5.000000e-01 : f32
    %7 = vector.broadcast %cst : f32 to vector<8x128xf32>
    %8 = arith.mulf %7, %4 : vector<8x128xf32>
    %9 = math.tanh %8 : vector<8x128xf32>
    %cst_6 = arith.constant 5.000000e-01 : f32
    %10 = vector.broadcast %cst_6 : f32 to vector<8x128xf32>
    %11 = arith.mulf %10, %9 : vector<8x128xf32>
    %cst_7 = arith.constant 5.000000e-01 : f32
    %12 = vector.broadcast %cst_7 : f32 to vector<8x128xf32>
    %13 = arith.addf %11, %12 : vector<8x128xf32>
    %cst_8 = arith.constant 5.000000e-01 : f32
    %14 = vector.broadcast %cst_8 : f32 to vector<8x128xf32>
    %15 = arith.subf %13, %14 : vector<8x128xf32>
    %cst_9 = arith.constant 1.883600e-04 : f32
    %16 = vector.broadcast %cst_9 : f32 to vector<8x128xf32>
    %17 = arith.mulf %16, %15 : vector<8x128xf32>
    %cst_10 = arith.constant 8.72969976E-4 : f32
    %18 = vector.broadcast %cst_10 : f32 to vector<8x128xf32>
    %19 = arith.addf %17, %18 : vector<8x128xf32>
    %20 = arith.mulf %19, %15 : vector<8x128xf32>
    %cst_11 = arith.constant -4.014860e-03 : f32
    %21 = vector.broadcast %cst_11 : f32 to vector<8x128xf32>
    %22 = arith.addf %20, %21 : vector<8x128xf32>
    %23 = arith.mulf %22, %15 : vector<8x128xf32>
    %cst_12 = arith.constant -9.592800e-03 : f32
    %24 = vector.broadcast %cst_12 : f32 to vector<8x128xf32>
    %25 = arith.addf %23, %24 : vector<8x128xf32>
    %26 = arith.mulf %25, %15 : vector<8x128xf32>
    %cst_13 = arith.constant 0.117501862 : f32
    %27 = vector.broadcast %cst_13 : f32 to vector<8x128xf32>
    %28 = arith.addf %26, %27 : vector<8x128xf32>
    %29 = arith.mulf %28, %15 : vector<8x128xf32>
    %cst_14 = arith.constant -0.377540678 : f32
    %30 = vector.broadcast %cst_14 : f32 to vector<8x128xf32>
    %31 = arith.addf %29, %30 : vector<8x128xf32>
    %32 = arith.mulf %31, %15 : vector<8x128xf32>
    %cst_15 = arith.constant 4.740770e-01 : f32
    %33 = vector.broadcast %cst_15 : f32 to vector<8x128xf32>
    %34 = arith.addf %32, %33 : vector<8x128xf32>
    %c0_16 = arith.constant 0 : index
    %c0_17 = arith.constant 0 : index
    %c0_18 = arith.constant 0 : index
    %c0_19 = arith.constant 0 : index
    %35 = vector.load %arg5[%c0_16, %c0_17, %c0_18, %c0_19] : memref<1x1x32x128xf32, #tpu.memory_space<vmem>>, vector<1x1x8x128xf32>
    %36 = vector.shape_cast %35 : vector<1x1x8x128xf32> to vector<8x128xf32>
    %37 = arith.mulf %13, %6 : vector<8x128xf32>
    %38 = vector.shape_cast %37 : vector<8x128xf32> to vector<1x8x128xf32>
    %cst_20 = arith.constant dense<0.000000e+00> : vector<8x128xf32>
    %39 = vector.multi_reduction <add>, %38, %cst_20 [0] : vector<1x8x128xf32> to vector<8x128xf32>
    %40 = arith.addf %36, %39 : vector<8x128xf32>
    %c0_21 = arith.constant 0 : index
    %c0_22 = arith.constant 0 : index
    %c0_23 = arith.constant 0 : index
    %c0_24 = arith.constant 0 : index
    %41 = vector.load %arg5[%c0_21, %c0_22, %c0_23, %c0_24] : memref<1x1x32x128xf32, #tpu.memory_space<vmem>>, vector<1x1x8x128xf32>
    %42 = vector.shape_cast %41 : vector<1x1x8x128xf32> to vector<8x128xf32>
    %43 = vector.shape_cast %40 : vector<8x128xf32> to vector<1x1x8x128xf32>
    tpu.vector_store %arg5[%c0_21, %c0_22, %c0_23, %c0_24], %43 {strides = array<i32>} : memref<1x1x32x128xf32, #tpu.memory_space<vmem>>, vector<1x1x8x128xf32>,
    %c0_25 = arith.constant 0 : index
    %c0_26 = arith.constant 0 : index
    %c8 = arith.constant 8 : index
    %c0_27 = arith.constant 0 : index
    %44 = vector.load %arg5[%c0_25, %c0_26, %c8, %c0_27] : memref<1x1x32x128xf32, #tpu.memory_space<vmem>>, vector<1x1x8x128xf32>
    %45 = vector.shape_cast %44 : vector<1x1x8x128xf32> to vector<8x128xf32>
    %46 = vector.shape_cast %13 : vector<8x128xf32> to vector<1x8x128xf32>
    %cst_28 = arith.constant dense<0.000000e+00> : vector<8x128xf32>
    %47 = vector.multi_reduction <add>, %46, %cst_28 [0] : vector<1x8x128xf32> to vector<8x128xf32>
    %48 = arith.addf %45, %47 : vector<8x128xf32>
    %c0_29 = arith.constant 0 : index
    %c0_30 = arith.constant 0 : index
    %c8_31 = arith.constant 8 : index
    %c0_32 = arith.constant 0 : index
    %49 = vector.load %arg5[%c0_29, %c0_30, %c8_31, %c0_32] : memref<1x1x32x128xf32, #tpu.memory_space<vmem>>, vector<1x1x8x128xf32>
    %50 = vector.shape_cast %49 : vector<1x1x8x128xf32> to vector<8x128xf32>
    %51 = vector.shape_cast %48 : vector<8x128xf32> to vector<1x1x8x128xf32>
    tpu.vector_store %arg5[%c0_29, %c0_30, %c8_31, %c0_32], %51 {strides = array<i32>} : memref<1x1x32x128xf32, #tpu.memory_space<vmem>>, vector<1x1x8x128xf32>,
    %c0_33 = arith.constant 0 : index
    %c0_34 = arith.constant 0 : index
    %c16 = arith.constant 16 : index
    %c0_35 = arith.constant 0 : index
    %52 = vector.load %arg5[%c0_33, %c0_34, %c16, %c0_35] : memref<1x1x32x128xf32, #tpu.memory_space<vmem>>, vector<1x1x8x128xf32>
    %53 = vector.shape_cast %52 : vector<1x1x8x128xf32> to vector<8x128xf32>
    %54 = vector.shape_cast %6 : vector<8x128xf32> to vector<1x8x128xf32>
    %cst_36 = arith.constant dense<0.000000e+00> : vector<8x128xf32>
    %55 = vector.multi_reduction <add>, %54, %cst_36 [0] : vector<1x8x128xf32> to vector<8x128xf32>
    %56 = arith.addf %53, %55 : vector<8x128xf32>
    %c0_37 = arith.constant 0 : index
    %c0_38 = arith.constant 0 : index
    %c16_39 = arith.constant 16 : index
    %c0_40 = arith.constant 0 : index
    %57 = vector.load %arg5[%c0_37, %c0_38, %c16_39, %c0_40] : memref<1x1x32x128xf32, #tpu.memory_space<vmem>>, vector<1x1x8x128xf32>
    %58 = vector.shape_cast %57 : vector<1x1x8x128xf32> to vector<8x128xf32>
    %59 = vector.shape_cast %56 : vector<8x128xf32> to vector<1x1x8x128xf32>
    tpu.vector_store %arg5[%c0_37, %c0_38, %c16_39, %c0_40], %59 {strides = array<i32>} : memref<1x1x32x128xf32, #tpu.memory_space<vmem>>, vector<1x1x8x128xf32>,
    %c0_41 = arith.constant 0 : index
    %c0_42 = arith.constant 0 : index
    %c24 = arith.constant 24 : index
    %c0_43 = arith.constant 0 : index
    %60 = vector.load %arg5[%c0_41, %c0_42, %c24, %c0_43] : memref<1x1x32x128xf32, #tpu.memory_space<vmem>>, vector<1x1x8x128xf32>
    %61 = vector.shape_cast %60 : vector<1x1x8x128xf32> to vector<8x128xf32>
    %62 = vector.shape_cast %34 : vector<8x128xf32> to vector<1x8x128xf32>
    %cst_44 = arith.constant dense<0.000000e+00> : vector<8x128xf32>
    %63 = vector.multi_reduction <add>, %62, %cst_44 [0] : vector<1x8x128xf32> to vector<8x128xf32>
    %64 = arith.addf %61, %63 : vector<8x128xf32>
    %c0_45 = arith.constant 0 : index
    %c0_46 = arith.constant 0 : index
    %c24_47 = arith.constant 24 : index
    %c0_48 = arith.constant 0 : index
    %65 = vector.load %arg5[%c0_45, %c0_46, %c24_47, %c0_48] : memref<1x1x32x128xf32, #tpu.memory_space<vmem>>, vector<1x1x8x128xf32>
    %66 = vector.shape_cast %65 : vector<1x1x8x128xf32> to vector<8x128xf32>
    %67 = vector.shape_cast %64 : vector<8x128xf32> to vector<1x1x8x128xf32>
    tpu.vector_store %arg5[%c0_45, %c0_46, %c24_47, %c0_48], %67 {strides = array<i32>} : memref<1x1x32x128xf32, #tpu.memory_space<vmem>>, vector<1x1x8x128xf32>,
    return
  }
  func.func @transform_0(%arg0: i32, %arg1: i32, %arg2: i32) -> (i32, i32, i32) {
    %c0_i32 = arith.constant 0 : i32
    %c0_i32_0 = arith.constant 0 : i32
    return %arg1, %arg2, %c0_i32 : i32, i32, i32
  }
  func.func @transform_1(%arg0: i32, %arg1: i32, %arg2: i32) -> (i32, i32, i32) {
    %c0_i32 = arith.constant 0 : i32
    %c0_i32_0 = arith.constant 0 : i32
    return %arg1, %arg2, %c0_i32 : i32, i32, i32
  }
  func.func @transform_2(%arg0: i32, %arg1: i32, %arg2: i32) -> (i32, i32, i32, i32) {
    %c0_i32 = arith.constant 0 : i32
    %c0_i32_0 = arith.constant 0 : i32
    %c0_i32_1 = arith.constant 0 : i32
    return %arg0, %arg1, %c0_i32, %c0_i32_0 : i32, i32, i32, i32
  }
}

</mosaic_0001>

<bundles_post_ra>
// kernel: tpu_custom_call.1
= control target key start
LH: loop header
LB: loop body
LE: loop exit
PB: predicated region body
PF: predicated region fallthrough
CT: control target
= control target key end

     0   :  { %7 = vsyncpa [#allocation3], 0  ;;  %s824_s0 = inlined_call_operand.hbm [shape: f32[2,8,128], index: 0, kind: input, shape index: {}]   ;;  %s825_s1 = inlined_call_operand.hbm [shape: f32[2,8,128], index: 1, kind: input, shape index: {}]   ;;  %s826_s2 = inlined_call_operand.hbm [shape: f32[1,2,32,128], index: 2, kind: output, shape index: {}]  }
   0x1   :  { %9 = vsyncpa [#allocation3 + $0x1], 0 }
   0x2   :  { %10 = vsyncpa [#allocation6], 0 }
   0x3   :  { %12 = vsyncpa [#allocation6 + $0x1], 0 }
   0x4   :  { %13 = vsyncpa [#allocation4], 0 }
   0x5   :  { %15 = vsyncpa [#allocation4 + $0x1], 0  ;;  %s648_s9 = smov 0   ;;  %s650_s10 = smov 0  }
   0x6   :  { %s652_s11 = smov 0   ;;  %s654_s12 = smov 0  }
   0x7   :  { %s656_s13 = smov 0   ;;  %s658_s14 = smov 0  }
   0x8 LB: > { %s395_s15 = sadd.s32 4294967295, %s626_s14   ;;  %s396_s16 = sadd.s32 4294967294, %s626_s14   ;;  %s626_s14 = sphi %s658_s14, %s21_s14   ;;  %s622_s13 = sphi %s656_s13, %s838_s13   ;;  %s618_s12 = sphi %s654_s12, %s837_s12   ;;  %s614_s11 = sphi %s652_s11, %s836_s11   ;;  %s610_s10 = sphi %s650_s10, %s835_s10   ;;  %s606_s9 = sphi %s648_s9, %s834_s9  }
   0x9   : > { %s36_s17 = sadd.s32 1, %s622_s13  ;;  %s49_s18 = sadd.s32 1, %s614_s11 }
   0xa   : > { %p38_p0 = scmp.ge.s32.totalorder %s36_s17, 2  ;;  %p56_p1 = scmp.ne.s32.totalorder %s614_s11, %s610_s10 }
   0xb   : > { %p57_p2 = scmp.eq.s32.totalorder %s626_s14, 0  ;;  %p62_p3 = scmp.ne.s32.totalorder %s610_s10, %s606_s9 }
   0xc   : > { %s840_s17 = smov (%p38_p0, %s36_s17), 0  ;;  %p63_p5 = scmp.eq.s32.totalorder %s395_s15, 0 }
   0xd   : > { %p689_p4 = por %p57_p2, %p56_p1  ;;  %s44_s20 = ssub.s32 %s622_s13, %s840_s17 }
   0xe   : > { %p116_p6 = scmp.eq.s32.totalorder %s395_s15, 1  ;;  %p47_p7 = scmp.eq.s32.totalorder %s44_s20, 0 }
   0xf   : > { %p695_p8 = por %p63_p5, %p62_p3  ;;  %p122_p10 = scmp.eq.s32.totalorder %s396_s16, 1 }
  0x10   : > { %p699_p9 = por %p116_p6, %p56_p1  ;;  %p431_p13 = scmp.lt.s32.totalorder %s626_s14, 2 }
  0x11   : > { %s704_s23 = scalar_select %p47_p7, %s614_s11, %s49_s18  }
  0x12   : > { %p706_p11 = por %p122_p10, %p62_p3  ;;  %s713_s25 = sand.u32 1, %s614_s11  }
  0x13   : > { %s399_s26 = sshll.u32 %s713_s25, 3  ;;  %s400_s27 = sshll.u32 %s622_s13, 7 }
  0x14   : > { %s152_s30 = scalar_lea.hbm %s824_s0, %s400_s27  ;;  %s146_s3 = scalar_lea.vmem [#allocation2], %s399_s26 }
  0x15   : > { %s154_s4 = sshll.u32 %s146_s3, 4  ;;  %p722_p0 = pnand %p431_p13, %p689_p4  ;;  %s155_s4 = int_to_ptr.vmem [resolvable:$true] %s154_s4 }
  0x16   : > { %p403_p1 = scmp.ge.s32.totalorder %s626_s14, 1  ;;  %p178_p2 = scmp.lt.s32.totalorder %s626_s14, 3 }
  0x17   : > { %s143_s6 = scalar_lea.sflag [#allocation3], %s713_s25  ;;  %p488_p3 = pneg %p722_p0 }
  0x18   : > { %s499_s7 = scalar_lea.vmem %s155_s4, 128  ;;  %s628_s8 = smov [#allocation2]  }
  0x19   : > { %p500_p5 = scmp.ne.s32.totalorder %s155_s4, %s499_s7  ;;  %s504_s15 = sshll.u32 %s628_s8, 4  ;;  %s505_s15 = int_to_ptr.vmem [resolvable:$false] %s504_s15 }
  0x1a   : > { %s506_s16 = scalar_lea.vmem %s505_s15, 256  ;;  %p507_p4 = scmp.lt.s32.totalorder %s155_s4, %s505_s15 }
  0x1b   : > { %p502_p6 = pnand %p500_p5, %p488_p3  ;;  %p508_p10 = scmp.lt.s32.totalorder %s506_s16, %s499_s7 }
  0x1d   : > { %p503_p7 = pneg %p502_p6  ;;  %p509_p13 = por %p508_p10, %p507_p4 }
  0x1f   : > { %p510_p12 = pnand %p509_p13, %p503_p7 }
  0x21   : > { %513 = shalt.err (!%p510_p12)
}
  0x22   : > { %423 = dma.hbm_to_vmem [thread:$0]  (!%p722_p0), %s152_s30, 128, %s155_s4, %s143_s6  }
  0x23   : > { %p740_p5 = pnand %p403_p1, %p178_p2  ;;  %s171_s28 = scalar_lea.hbm %s825_s1, %s400_s27 }
  0x24   : > { %s165_s29 = scalar_lea.vmem [#allocation5], %s399_s26  ;;  %s162_s7 = scalar_lea.sflag [#allocation6], %s713_s25 }
  0x25   : > { %s173_s3 = sshll.u32 %s165_s29, 4  ;;  %s629_s30 = smov [#allocation5]   ;;  %s174_s3 = int_to_ptr.vmem [resolvable:$true] %s173_s3 }
  0x26   : > { %s527_s8 = scalar_lea.vmem %s174_s3, 128  ;;  %s532_s4 = sshll.u32 %s629_s30, 4  ;;  %s533_s4 = int_to_ptr.vmem [resolvable:$false] %s532_s4 }
  0x27   : > { %p528_p12 = scmp.ne.s32.totalorder %s174_s3, %s527_s8  ;;  %s534_s6 = scalar_lea.vmem %s533_s4, 256 }
  0x28   : > { %p535_p1 = scmp.lt.s32.totalorder %s174_s3, %s533_s4  ;;  %p536_p2 = scmp.lt.s32.totalorder %s534_s6, %s527_s8 }
  0x29   : > { %p530_p6 = pnand %p528_p12, %p488_p3 }
  0x2a   : > { %p537_p4 = por %p536_p2, %p535_p1 }
  0x2b   : > { %p531_p7 = pneg %p530_p6 }
  0x2d   : > { %p538_p10 = pnand %p537_p4, %p531_p7 }
  0x2f   : > { %541 = shalt.err (!%p538_p10)
}
  0x30   : > { %426 = dma.hbm_to_vmem [thread:$0]  (!%p722_p0), %s171_s28, 128, %s174_s3, %s162_s7  }
  0x31   : > { %182 = sbr.rel (%p740_p5) target bundleno = 118 (0x76), region = 28  ;;  %s756_s25 = sand.u32 (!%p740_p5), 1, %s610_s10  }
  0x32   : > { %s404_s26 = sshll.u32 (!%p740_p5), %s756_s25, 3  ;;  %s185_s27 = scalar_lea.sflag (!%p740_p5), [#allocation3], %s756_s25 }
  0x33   : > { %s188_s15 = scalar_lea.vmem (!%p740_p5), [#allocation2], %s404_s26 }
  0x36   : > { %593 = dma.done.wait (%p695_p8), %s185_s27, 128  }
  0x37   : > { %595 = vsyncadd (%p695_p8), %s185_s27, 4294967168  ;;  %s194_s5 = scalar_lea.sflag [#allocation6], %s756_s25  ;;  %s197_s16 = scalar_lea.vmem [#allocation5], %s404_s26 }
  0x38   : > { %597 = dma.done.wait (%p695_p8), %s194_s5, 128  }
  0x39   : > { %599 = vsyncadd (%p695_p8), %s194_s5, 4294967168  ;;  %s406_s18 = sshll.u32 %s756_s25, 5  ;;  %v231_v0 = vld [vmem:[%s188_s15] sm:$0xff]  ;;  %v232_v1 = vld [vmem:[%s197_s16] sm:$0xff]  ;;  %s413_s21 = sshll.u32 %s618_s12, 9 }
  0x3a   : > { %v233_v2 = vmul.f32 0.5, %v231_v0  ;;  %s222_s19 = scalar_lea.vmem [#allocation7], %s406_s18  ;;  %s774_s3 = scalar_lea.hbm %s826_s2, %s413_s21 }
  0x3b   : > { %262 = vst [vmem:[%s222_s19 + $0x10] sm:$0xff] %v232_v1  ;;  %s283_s20 = sshll.u32 %s222_s19, 4  ;;  %s268_s7 = scalar_lea.sflag [#allocation4], %s756_s25  ;;  %s776_s20 = int_to_ptr.vmem [resolvable:$true] %s283_s20 }
  0x3c   : > { %484 = vtanh.f32 %v233_v2  ;;  %s542_s8 = scalar_lea.vmem %s776_s20, 512  ;;  %s630_s12 = smov [#allocation7]  }
  0x3d   : > { %p543_p8 = scmp.ne.s32.totalorder %s776_s20, %s542_s8  ;;  %s546_s30 = sshll.u32 %s630_s12, 4  ;;  %s547_s30 = int_to_ptr.vmem [resolvable:$false] %s546_s30 }
  0x3e   : > { %s548_s4 = scalar_lea.vmem %s547_s30, 1024  ;;  %p549_p13 = scmp.lt.s32.totalorder %s776_s20, %s547_s30 }
  0x3f   : > { %p544_p0 = pnand %p543_p8, %p699_p9  ;;  %p550_p5 = scmp.lt.s32.totalorder %s548_s4, %s542_s8 }
  0x41   : > { %p545_p3 = pneg %p544_p0  ;;  %p551_p12 = por %p550_p5, %p549_p13 }
  0x43   : > { %p552_p6 = pnand %p551_p12, %p545_p3 }
  0x49   : > { %v485_v3 = vpop.eup %484 }
  0x4a   : > { %v235_v4 = vmul.f32 0.5, %v485_v3 }
  0x4c   : > { %v236_v5 = vadd.f32 0.5, %v235_v4 }
  0x4e   : > { %v407_v6 = vadd.f32 -0.5, %v236_v5  ;;  %v251_v7 = vmul.f32 %v236_v5, %v232_v1  ;;  %258 = vst [vmem:[%s222_s19 + $0x8] sm:$0xff] %v236_v5 }
  0x50   : > { %v238_v8 = vmul.f32 0.00018836, %v407_v6  ;;  %254 = vst [vmem:[%s222_s19] sm:$0xff] %v251_v7 }
  0x52   : > { %v239_v9 = vadd.f32 0.00087297, %v238_v8 }
  0x54   : > { %v240_v10 = vmul.f32 %v407_v6, %v239_v9 }
  0x56   : > { %v241_v11 = vadd.f32 -0.00401486, %v240_v10 }
  0x58   : > { %v242_v12 = vmul.f32 %v407_v6, %v241_v11 }
  0x5a   : > { %v243_v13 = vadd.f32 -0.0095928, %v242_v12 }
  0x5c   : > { %v244_v14 = vmul.f32 %v407_v6, %v243_v13 }
  0x5e   : > { %v245_v15 = vadd.f32 0.11750186, %v244_v14 }
  0x60   : > { %v246_v16 = vmul.f32 %v407_v6, %v245_v15 }
  0x62   : > { %v247_v17 = vadd.f32 -0.37754068, %v246_v16 }
  0x64   : > { %v248_v18 = vmul.f32 %v407_v6, %v247_v17 }
  0x66   : > { %v249_v19 = vadd.f32 0.474077, %v248_v18 }
  0x68   : > { %266 = vst [vmem:[%s222_s19 + $0x18] sm:$0xff] %v249_v19 }
  0x69   : > { %555 = shalt.err (!%p552_p6)
}
  0x6a   : > { %s556_s6 = scalar_lea.hbm %s774_s3, 512  ;;  %s560_s15 = scalar_lea.hbm %s826_s2, 1024 }
  0x6b   : > { %p557_p7 = scmp.ne.s32.totalorder %s774_s3, %s556_s6  ;;  %p561_p4 = scmp.lt.s32.totalorder %s774_s3, %s826_s2 }
  0x6c   : > { %p562_p10 = scmp.lt.s32.totalorder %s560_s15, %s556_s6 }
  0x6d   : > { %p558_p1 = pnand %p557_p7, %p699_p9 }
  0x6e   : > { %p563_p8 = por %p562_p10, %p561_p4 }
  0x6f   : > { %p559_p2 = pneg %p558_p1 }
  0x71   : > { %p564_p0 = pnand %p563_p8, %p559_p2 }
  0x73   : > { %567 = shalt.err (!%p564_p0)
}
  0x74   : > { %s631_s18 = smov 128   ;;  %s632_s19 = smov 8  }
  0x75   : > { %418 = dma.vmem_to_hbm [thread:$0]  (%p699_p9), %s776_s20, 512, %s774_s3, %s268_s7, %s631_s18, %s631_s18, %s632_s19  }
  0x76 PF: > { %s298_s21 = sand.u32 1, %s606_s9   ;;  %p833_p3 = scmp.ge.s32.totalorder %s626_s14, 2 }
  0x77   : > { %s299_s28 = scalar_lea.sflag [#allocation4], %s298_s21 }
  0x78   : > { %p428_p13 = pnand %p833_p3, %p706_p11 }
  0x7a   : > { %p429_p5 = pneg %p428_p13 }
  0x7c   : > { %601 = dma.done.wait (%p429_p5), %s299_s28, 512  }
  0x7d   : > { %603 = vsyncadd (%p429_p5), %s299_s28, 4294966784  ;;  %s21_s14 = sadd.s32 1, %s626_s14   ;;  %s834_s9 = smov %s610_s10 }
  0x7e   : > { %p18_p12 = scmp.ge.s32.totalorder %s21_s14, 4   ;;  %s835_s10 = smov %s614_s11 }
  0x7f   : > { %s836_s11 = smov %s704_s23  ;;  %s837_s12 = smov %s622_s13 }
  0x80   : > { %s838_s13 = smov %s840_s17  ;;  %20 = sbr.rel (!%p18_p12) target bundleno = 8 (0x8), region = 90 }
  0x85   :  { %304 = vsyncpa [#allocation3], 1 }
  0x86   :  { %306 = vsyncpa [#allocation3 + $0x1], 1 }
  0x87   :  { %307 = vsyncpa [#allocation6], 1 }
  0x88   :  { %309 = vsyncpa [#allocation6 + $0x1], 1 }
  0x89   :  { %310 = vsyncpa [#allocation4], 1 }
  0x8a   :  { %312 = vsyncpa [#allocation4 + $0x1], 1 }

</bundles_post_ra>
